<compile_context>
chip_gen: v7x
topology: tpu7x:2x2x1
jax: 0.10.0
libtpu: 0.0.40
codegen_flags: <defaults>
</compile_context>

<pallas_src>
import jax
import jax.numpy as jnp
from jax.experimental import pallas as pl
from jax.experimental.pallas import tpu as pltpu


def _exp_neg_sq_kernel(x_ref, o_ref):
    x = x_ref[...].astype(jnp.float32)
    o_ref[...] = jnp.exp(-(x * x)).astype(o_ref.dtype)


_LANE = 128
# Below this element count (or for ragged sizes) XLA's fused elementwise loop
# is already at the HBM roofline; a Pallas launch only adds fixed overhead.
_MIN_PALLAS_ELEMENTS = 512 * 1024


def _ceil_div(a, b):
    return -(-a // b)


def _vmem_capacity_bytes():
    try:
        return int(pltpu.get_tpu_info().vmem_capacity_bytes)
    except Exception:
        return 64 * 1024 * 1024  # conservative default: v7x per-TensorCore VMEM


def _block_budget():
    """(target block bytes, vmem_limit_bytes), gated by TPU generation."""
    if _vmem_capacity_bytes() >= 100 * 1024 * 1024:   # v5e / v6e: 128 MiB VMEM
        return 8 * 1024 * 1024, 64 * 1024 * 1024
    return 4 * 1024 * 1024, 32 * 1024 * 1024          # v7x: 64 MiB per core


def _pick_cols(n):
    """Widest lane-multiple column width that divides n exactly."""
    for cols in (2048, 1024, 512, 256, 128):
        if n % cols == 0:
            return cols
    raise AssertionError("caller guarantees n % 128 == 0")


def _choose_rows_per_block(rows, sub, row_bytes, target_bytes):
    """Rows per block: multiple of `sub`, <= rows, within the byte budget,
    shaped so the 1-D grid has >= 4 (preferably even) steps for v7x megacore."""
    if rows <= sub:
        return rows
    tr = max(sub, (target_bytes // row_bytes) // sub * sub)
    tr = min(tr, (rows // sub) * sub)
    if rows < 4 * sub:
        return tr
    # Shrink blocks (never grow past the byte budget) until >= 4 grid steps.
    while _ceil_div(rows, tr) < 4 and tr > sub:
        tr = max(sub, (tr // 2) // sub * sub)
    steps = _ceil_div(rows, tr)
    # Prefer an even step count so the two v7x TensorCores stay balanced.
    if steps % 2 == 1 and steps < 16:
        base = _ceil_div(rows, steps + 1)
        for cand in (_ceil_div(base, sub) * sub, max(sub, (base // sub) * sub)):
            cand = min(cand, tr)
            s = _ceil_div(rows, cand)
            if cand >= sub and s >= 4 and s % 2 == 0:
                tr = cand
                break
    return tr


def exp_neg_sq(x, *, min_pallas_elements=_MIN_PALLAS_ELEMENTS):
    """Computes exp(-x**2) elementwise (Pallas TPU kernel for large aligned sizes)."""
    orig_shape = x.shape
    dtype = x.dtype
    n = x.size
    if n == 0:
        return x
    if not jnp.issubdtype(dtype, jnp.floating):
        # Float-only op; promote (torch.exp rejects / promotes integer inputs).
        xf = x.astype(jnp.float32)
        return jnp.exp(-(xf * xf))

    if n < min_pallas_elements or n % _LANE != 0:
        # Ragged / tiny sizes: plain XLA is 1 read + 1 write at roofline; the
        # old pad + output-slice path around pallas_call cost ~3x HBM traffic.
        # TODO(synk): an in-kernel masked-tail path (scalar-prefetch the true
        # length) would let ragged sizes use the Pallas kernel without padding.
        xf = x.astype(jnp.float32)
        return jnp.exp(-(xf * xf)).astype(dtype)

    itemsize = jnp.dtype(dtype).itemsize
    sub = max(8, 32 // itemsize)      # sublane granule: f32->8, bf16->16, 8-bit->32
    target_block_bytes, vmem_limit = _block_budget()

    cols = _pick_cols(n)
    rows = n // cols
    x2d = x.reshape(rows, cols)       # zero-copy view of the contiguous buffer

    tr = _choose_rows_per_block(rows, sub, cols * itemsize, target_block_bytes)
    grid = (pl.cdiv(rows, tr),)

    out2d = pl.pallas_call(
        _exp_neg_sq_kernel,
        out_shape=jax.ShapeDtypeStruct((rows, cols), dtype),
        grid=grid,
        in_specs=[pl.BlockSpec((tr, cols), lambda i: (i, 0))],
        out_specs=pl.BlockSpec((tr, cols), lambda i: (i, 0)),
        compiler_params=pltpu.CompilerParams(
            dimension_semantics=("parallel",),
            vmem_limit_bytes=vmem_limit,
        ),
        cost_estimate=pl.CostEstimate(
            flops=2 * n,
            transcendentals=n,
            bytes_accessed=2 * n * itemsize,
        ),
    )(x2d)

    return out2d.reshape(orig_shape)


if __name__ == "__main__":
    key = jax.random.PRNGKey(0)
    k1, k2, k3, k4 = jax.random.split(key, 4)

    # Small NCHW-like input (batch=2, channels=4, 16x16); force the Pallas path.
    x = jax.random.normal(k1, (2, 4, 16, 16), dtype=jnp.float32)
    y = jax.block_until_ready(exp_neg_sq(x, min_pallas_elements=0))
    y_ref = jnp.exp(-(x ** 2))
    assert y.shape == x.shape and y.dtype == x.dtype
    assert jnp.allclose(y, y_ref, atol=1e-6, rtol=1e-6)

    # Default entry point on the same input (small -> roofline XLA fallback).
    y_d = jax.block_until_ready(exp_neg_sq(x))
    assert jnp.allclose(y_d, y_ref, atol=1e-6, rtol=1e-6)

    # Moderate aligned shape: exercises the multi-step parallel grid.
    x2 = jax.random.normal(k2, (64, 2048), dtype=jnp.float32)
    y2 = jax.block_until_ready(exp_neg_sq(x2, min_pallas_elements=0))
    assert jnp.allclose(y2, jnp.exp(-(x2 ** 2)), atol=1e-6, rtol=1e-6)

    # Ragged element count: handled by the roofline-optimal XLA path (no pad/slice).
    x3 = jax.random.normal(k3, (3, 5, 7), dtype=jnp.float32)
    y3 = jax.block_until_ready(exp_neg_sq(x3))
    assert jnp.allclose(y3, jnp.exp(-(x3 ** 2)), atol=1e-6, rtol=1e-6)

    # bf16 input through the Pallas kernel (f32 math, cast back).
    x4 = jax.random.normal(k4, (4, 8, 32), dtype=jnp.bfloat16)
    y4 = jax.block_until_ready(exp_neg_sq(x4, min_pallas_elements=0))
    y4_ref = jnp.exp(-(x4.astype(jnp.float32) ** 2)).astype(jnp.bfloat16)
    assert y4.dtype == jnp.bfloat16
    assert jnp.allclose(
        y4.astype(jnp.float32), y4_ref.astype(jnp.float32), atol=2e-2, rtol=2e-2
    )

    print("KERNEL_OK")
</pallas_src>

<mosaic_0001>
module attributes {stable_mosaic.version = 11 : i64} {
  func.func @_exp_neg_sq_kernel(%arg0: i32, %arg1: memref<1x2048xf32, #tpu.memory_space<vmem>>, %arg2: memref<1x2048xf32, #tpu.memory_space<vmem>>) attributes {dimension_semantics = [#tpu.dimension_semantics<parallel>], iteration_bounds = array<i64: 1>, scalar_prefetch = 0 : i64, scratch_operands = 0 : i64, tpu.core_type = #tpu.core_type<tc>, window_params = [{transform_indices = @transform_0, window_bounds = array<i64: 1, 2048>}, {transform_indices = @transform_1, window_bounds = array<i64: 1, 2048>}]} {
    %c0 = arith.constant 0 : index
    %c0_0 = arith.constant 0 : index
    %0 = vector.load %arg1[%c0, %c0_0] : memref<1x2048xf32, #tpu.memory_space<vmem>>, vector<1x2048xf32>
    %1 = arith.mulf %0, %0 : vector<1x2048xf32>
    %cst = arith.constant 0.000000e+00 : f32
    %2 = vector.broadcast %cst : f32 to vector<1x2048xf32>
    %3 = arith.subf %2, %1 : vector<1x2048xf32>
    %4 = math.exp %3 : vector<1x2048xf32>
    %c0_1 = arith.constant 0 : index
    %c0_2 = arith.constant 0 : index
    %5 = vector.load %arg2[%c0_1, %c0_2] : memref<1x2048xf32, #tpu.memory_space<vmem>>, vector<1x2048xf32>
    tpu.vector_store %arg2[%c0_1, %c0_2], %4 {strides = array<i32>} : memref<1x2048xf32, #tpu.memory_space<vmem>>, vector<1x2048xf32>,
    return
  }
  func.func @transform_0(%arg0: i32) -> (i32, i32) {
    %c0_i32 = arith.constant 0 : i32
    %c0_i32_0 = arith.constant 0 : i32
    return %arg0, %c0_i32 : i32, i32
  }
  func.func @transform_1(%arg0: i32) -> (i32, i32) {
    %c0_i32 = arith.constant 0 : i32
    %c0_i32_0 = arith.constant 0 : i32
    return %arg0, %c0_i32 : i32, i32
  }
}

</mosaic_0001>

<bundles_post_ra>
// kernel: tpu_custom_call.1
= control target key start
LH: loop header
LB: loop body
LE: loop exit
PB: predicated region body
PF: predicated region fallthrough
CT: control target
= control target key end

     0   :  { %6 = vsyncpa [#allocation3], 0  ;;  %s138_s0 = inlined_call_operand.hbm [shape: f32[1,2048], index: 0, kind: input, shape index: {}]   ;;  %s139_s1 = inlined_call_operand.hbm [shape: f32[1,2048], index: 1, kind: output, shape index: {}]  }
   0x1   :  { %7 = vsyncpa [#allocation4], 0  ;;  %s102_s6 = smov [#allocation2]   ;;  %s54_s10 = scalar_lea.hbm %s138_s0, 256 }
   0x2   :  { %s14_s7 = sshll.u32 %s102_s6, 4  ;;  %p55_p0 = scmp.ne.s32.totalorder %s138_s0, %s54_s10  ;;  %s15_s7 = int_to_ptr.vmem [resolvable:$true] %s14_s7 }
   0x3   :  { %p58_p1 = scmp.lt.u32.totalorder %s54_s10, %s138_s0 }
   0x5   :  { %p60_p2 = pnand %p58_p1, %p55_p0 }
   0x7   :  { %63 = shalt.err (!%p60_p2)
}
   0x8   :  { %s64_s15 = scalar_lea.vmem %s15_s7, 256  ;;  %p69_p4 = scmp.lt.s32.totalorder %s15_s7, %s15_s7 }
   0x9   :  { %p65_p3 = scmp.ne.s32.totalorder %s15_s7, %s64_s15  ;;  %p70_p5 = scmp.lt.s32.totalorder %s64_s15, %s64_s15 }
   0xb   :  { %p71_p6 = por %p70_p5, %p69_p4 }
   0xd   :  { %p72_p7 = pnand %p71_p6, %p65_p3 }
   0xf   :  { %75 = shalt.err (!%p72_p7)
}
  0x10   :  { %17 = dma.hbm_to_vmem [thread:$0]  %s138_s0, 256, %s15_s7, [#allocation3]  }
  0x11   :  { %98 = dma.done.wait [#allocation3], 256  }
  0x12   :  { %99 = vsyncadd [#allocation3], 4294967040  ;;  %v21_v0 = vld [vmem:[#allocation2] sm:$0xff]  ;;  %v22_v1 = vld [vmem:[#allocation2 + $0x8] sm:$0xff]  ;;  %s103_s18 = smov [#allocation5]  }
  0x13   :  { %v23_v2 = vmul.f32 %v21_v0, %v21_v0  ;;  %v24_v3 = vmul.f32 %v22_v1, %v22_v1  ;;  %s39_s19 = sshll.u32 %s103_s18, 4  ;;  %s40_s19 = int_to_ptr.vmem [resolvable:$true] %s39_s19 }
  0x14   :  { %s76_s0 = scalar_lea.vmem %s40_s19, 256  ;;  %p81_p9 = scmp.lt.s32.totalorder %s40_s19, %s40_s19 }
  0x15   :  { %v25_v4 = vsub.f32 0.0, %v23_v2  ;;  %v26_v5 = vsub.f32 0.0, %v24_v3  ;;  %p77_p8 = scmp.ne.s32.totalorder %s40_s19, %s76_s0  ;;  %p82_p10 = scmp.lt.s32.totalorder %s76_s0, %s76_s0 }
  0x17   :  { %v27_v6 = vmul.f32 1.442695, %v25_v4  ;;  %v29_v7 = vmul.f32 1.442695, %v26_v5  ;;  %p83_p11 = por %p82_p10, %p81_p9 }
  0x19   :  { %50 = vpow2.f32 %v27_v6  ;;  %p84_p12 = pnand %p83_p11, %p77_p8 }
  0x1a   :  { %52 = vpow2.f32 %v29_v7 }
  0x23   :  { %v51_v8 = vpop.eup %50 }
  0x24   :  { %v53_v9 = vpop.eup %52  ;;  %31 = vst [vmem:[#allocation5] sm:$0xff] %v51_v8 }
  0x25   :  { %32 = vst [vmem:[#allocation5 + $0x8] sm:$0xff] %v53_v9 }
  0x26   :  { %87 = shalt.err (!%p84_p12)
}
  0x27   :  { %s88_s22 = scalar_lea.hbm %s139_s1, 256 }
  0x28   :  { %p89_p13 = scmp.ne.s32.totalorder %s139_s1, %s88_s22  ;;  %p92_p0 = scmp.lt.u32.totalorder %s88_s22, %s139_s1 }
  0x2a   :  { %p94_p1 = pnand %p92_p0, %p89_p13 }
  0x2c   :  { %97 = shalt.err (!%p94_p1)
}
  0x2d   :  { %42 = dma.vmem_to_hbm [thread:$0]  %s40_s19, 256, %s139_s1, [#allocation4]  }
  0x2e   :  { %100 = dma.done.wait [#allocation4], 256  }
  0x2f   :  { %101 = vsyncadd [#allocation4], 4294967040 }
  0x30   :  { %46 = vsyncpa [#allocation3], 1 }
  0x31   :  { %47 = vsyncpa [#allocation4], 1 }

</bundles_post_ra>
